<compile_context>
chip_gen: v6e
topology: v6e:2x2x1
jax: 0.10.0
libtpu: 0.0.40
codegen_flags: <defaults>
</compile_context>

<pallas_src>
import jax
import jax.numpy as jnp
from jax.experimental import pallas as pl
from jax.experimental.pallas import tpu as pltpu

EPS = 1e-05
GELU_C = 0.7978845608028654  # sqrt(2/pi)


def layernorm_gelu_kernel(x_ref, w_ref, b_ref, o_ref):
    x = x_ref[...].astype(jnp.float32)                     # (tm, M)

    # --- LayerNorm statistics (biased variance, like nn.LayerNorm) ---
    mean = jnp.mean(x, axis=-1, keepdims=True)             # (tm, 1)
    xc = x - mean
    var = jnp.mean(xc * xc, axis=-1, keepdims=True)        # (tm, 1)
    inv = jax.lax.rsqrt(var + EPS)

    # --- affine: y = (x - mean) * (inv * w) + b ---
    w = w_ref[...].astype(jnp.float32)                     # (1, M)
    b = b_ref[...].astype(jnp.float32)                     # (1, M)
    y = xc * (inv * w) + b

    # --- tanh GELU (exact formula from the PyTorch module) ---
    inner = GELU_C * (y + 0.044715 * (y * y * y))
    o_ref[...] = (y * 0.5 * (1.0 + jnp.tanh(inner))).astype(o_ref.dtype)


def _choose_tm(n, m, itemsize):
    """Row tile: big enough to saturate HBM BW, small enough for VMEM
    double-buffering on every chip (v5e/v6e: 128 MiB, v7x: 64 MiB)."""
    budget = 8 << 20                          # target in+out tile-pair bytes
    tm = budget // (2 * m * itemsize)
    tm = max(8, (tm // 8) * 8)                # sublane (8) alignment
    tm = min(tm, 2048)
    if tm >= n:
        return n                              # full-extent block is always legal
    return tm


def layernorm_gelu(x, weight, bias, *, tm=None):
    N, M = x.shape
    itemsize = jnp.dtype(x.dtype).itemsize
    if tm is None:
        tm = _choose_tm(N, M, itemsize)
    grid = (pl.cdiv(N, tm),)                  # partial last block handled by Pallas

    w2 = weight.reshape(1, M)
    b2 = bias.reshape(1, M)

    # Explicit scoped-VMEM limit: covers double-buffered 4 MiB in/out tiles with
    # headroom, and stays well inside v7x's 64 MiB physical VMEM.
    vmem_limit = 48 * 1024 * 1024

    return pl.pallas_call(
        layernorm_gelu_kernel,
        out_shape=jax.ShapeDtypeStruct((N, M), x.dtype),
        grid_spec=pltpu.PrefetchScalarGridSpec(
            num_scalar_prefetch=0,
            grid=grid,
            in_specs=[
                pl.BlockSpec((tm, M), lambda i: (i, 0)),
                pl.BlockSpec((1, M), lambda i: (0, 0)),   # constant block -> DMAed once
                pl.BlockSpec((1, M), lambda i: (0, 0)),
            ],
            out_specs=pl.BlockSpec((tm, M), lambda i: (i, 0)),
        ),
        compiler_params=pltpu.CompilerParams(
            dimension_semantics=("parallel",),
            vmem_limit_bytes=vmem_limit,
        ),
    )(x, w2, b2)


def reference(x, weight, bias):
    mean = jnp.mean(x, axis=-1, keepdims=True)
    var = jnp.mean((x - mean) ** 2, axis=-1, keepdims=True)
    y = (x - mean) / jnp.sqrt(var + EPS) * weight + bias
    return y * 0.5 * (1.0 + jnp.tanh(GELU_C * (y + 0.044715 * y ** 3)))


if __name__ == "__main__":
    # Small deterministic test shape consistent with the module: x is [N, M].
    N, M = 64, 128
    key = jax.random.PRNGKey(0)
    x = jax.random.normal(key, (N, M), dtype=jnp.float32)
    # nn.LayerNorm(dim) defaults: weight=ones, bias=zeros (deterministic init).
    weight = jnp.ones((M,), dtype=jnp.float32)
    bias = jnp.zeros((M,), dtype=jnp.float32)

    out = layernorm_gelu(x, weight, bias)
    jax.block_until_ready(out)

    ref = reference(x, weight, bias)
    assert out.shape == ref.shape
    assert jnp.allclose(out, ref, atol=1e-4, rtol=1e-5), "mismatch vs reference"
    print("KERNEL_OK")
</pallas_src>

<mosaic_0001>
module attributes {stable_mosaic.version = 11 : i64} {
  func.func @layernorm_gelu_kernel(%arg0: i32, %arg1: memref<64x128xf32, #tpu.memory_space<vmem>>, %arg2: memref<1x128xf32, #tpu.memory_space<vmem>>, %arg3: memref<1x128xf32, #tpu.memory_space<vmem>>, %arg4: memref<64x128xf32, #tpu.memory_space<vmem>>) attributes {dimension_semantics = [#tpu.dimension_semantics<parallel>], iteration_bounds = array<i64: 1>, scalar_prefetch = 0 : i64, scratch_operands = 0 : i64, tpu.core_type = #tpu.core_type<tc>, window_params = [{transform_indices = @transform_0, window_bounds = array<i64: 64, 128>}, {pipeline_mode = #tpu.pipeline_mode<synchronous>, transform_indices = @transform_1, window_bounds = array<i64: 1, 128>}, {pipeline_mode = #tpu.pipeline_mode<synchronous>, transform_indices = @transform_2, window_bounds = array<i64: 1, 128>}, {transform_indices = @transform_3, window_bounds = array<i64: 64, 128>}]} {
    %c0 = arith.constant 0 : index
    %c0_0 = arith.constant 0 : index
    %0 = vector.load %arg1[%c0, %c0_0] : memref<64x128xf32, #tpu.memory_space<vmem>>, vector<64x128xf32>
    %cst = arith.constant dense<0.000000e+00> : vector<64xf32>
    %1 = vector.multi_reduction <add>, %0, %cst [1] : vector<64x128xf32> to vector<64xf32>
    %2 = vector.shape_cast %1 : vector<64xf32> to vector<64x1xf32>
    %cst_1 = arith.constant 1.280000e+02 : f32
    %3 = vector.broadcast %cst_1 : f32 to vector<64x1xf32>
    %4 = arith.divf %2, %3 : vector<64x1xf32>
    %5 = vector.broadcast %4 : vector<64x1xf32> to vector<64x128xf32>
    %6 = arith.subf %0, %5 : vector<64x128xf32>
    %7 = arith.mulf %6, %6 : vector<64x128xf32>
    %cst_2 = arith.constant dense<0.000000e+00> : vector<64xf32>
    %8 = vector.multi_reduction <add>, %7, %cst_2 [1] : vector<64x128xf32> to vector<64xf32>
    %9 = vector.shape_cast %8 : vector<64xf32> to vector<64x1xf32>
    %cst_3 = arith.constant 1.280000e+02 : f32
    %10 = vector.broadcast %cst_3 : f32 to vector<64x1xf32>
    %11 = arith.divf %9, %10 : vector<64x1xf32>
    %cst_4 = arith.constant 9.99999974E-6 : f32
    %12 = vector.broadcast %cst_4 : f32 to vector<64x1xf32>
    %13 = arith.addf %11, %12 : vector<64x1xf32>
    %14 = math.rsqrt %13 : vector<64x1xf32>
    %c0_5 = arith.constant 0 : index
    %c0_6 = arith.constant 0 : index
    %15 = vector.load %arg2[%c0_5, %c0_6] : memref<1x128xf32, #tpu.memory_space<vmem>>, vector<1x128xf32>
    %c0_7 = arith.constant 0 : index
    %c0_8 = arith.constant 0 : index
    %16 = vector.load %arg3[%c0_7, %c0_8] : memref<1x128xf32, #tpu.memory_space<vmem>>, vector<1x128xf32>
    %17 = vector.broadcast %14 : vector<64x1xf32> to vector<64x128xf32>
    %18 = vector.broadcast %15 : vector<1x128xf32> to vector<64x128xf32>
    %19 = arith.mulf %17, %18 : vector<64x128xf32>
    %20 = arith.mulf %6, %19 : vector<64x128xf32>
    %21 = vector.broadcast %16 : vector<1x128xf32> to vector<64x128xf32>
    %22 = arith.addf %20, %21 : vector<64x128xf32>
    %23 = arith.mulf %22, %22 : vector<64x128xf32>
    %24 = arith.mulf %23, %22 : vector<64x128xf32>
    %cst_9 = arith.constant 4.471500e-02 : f32
    %25 = vector.broadcast %cst_9 : f32 to vector<64x128xf32>
    %26 = arith.mulf %25, %24 : vector<64x128xf32>
    %27 = arith.addf %22, %26 : vector<64x128xf32>
    %cst_10 = arith.constant 0.797884583 : f32
    %28 = vector.broadcast %cst_10 : f32 to vector<64x128xf32>
    %29 = arith.mulf %28, %27 : vector<64x128xf32>
    %cst_11 = arith.constant 5.000000e-01 : f32
    %30 = vector.broadcast %cst_11 : f32 to vector<64x128xf32>
    %31 = arith.mulf %22, %30 : vector<64x128xf32>
    %32 = math.tanh %29 : vector<64x128xf32>
    %cst_12 = arith.constant 1.000000e+00 : f32
    %33 = vector.broadcast %cst_12 : f32 to vector<64x128xf32>
    %34 = arith.addf %33, %32 : vector<64x128xf32>
    %35 = arith.mulf %31, %34 : vector<64x128xf32>
    %c0_13 = arith.constant 0 : index
    %c0_14 = arith.constant 0 : index
    %36 = vector.load %arg4[%c0_13, %c0_14] : memref<64x128xf32, #tpu.memory_space<vmem>>, vector<64x128xf32>
    tpu.vector_store %arg4[%c0_13, %c0_14], %35 {strides = array<i32>} : memref<64x128xf32, #tpu.memory_space<vmem>>, vector<64x128xf32>,
    return
  }
  func.func @transform_0(%arg0: i32) -> (i32, i32) {
    %c0_i32 = arith.constant 0 : i32
    %c0_i32_0 = arith.constant 0 : i32
    return %arg0, %c0_i32 : i32, i32
  }
  func.func @transform_1(%arg0: i32) -> (i32, i32) {
    %c0_i32 = arith.constant 0 : i32
    %c0_i32_0 = arith.constant 0 : i32
    %c0_i32_1 = arith.constant 0 : i32
    return %c0_i32, %c0_i32_0 : i32, i32
  }
  func.func @transform_2(%arg0: i32) -> (i32, i32) {
    %c0_i32 = arith.constant 0 : i32
    %c0_i32_0 = arith.constant 0 : i32
    %c0_i32_1 = arith.constant 0 : i32
    return %c0_i32, %c0_i32_0 : i32, i32
  }
  func.func @transform_3(%arg0: i32) -> (i32, i32) {
    %c0_i32 = arith.constant 0 : i32
    %c0_i32_0 = arith.constant 0 : i32
    return %arg0, %c0_i32 : i32, i32
  }
}

</mosaic_0001>

<bundles_post_ra>
// kernel: tpu_custom_call.1
= control target key start
LH: loop header
LB: loop body
LE: loop exit
PB: predicated region body
PF: predicated region fallthrough
CT: control target
= control target key end

     0   :  { %8 = vsyncpa [#allocation3], 0  ;;  %s462_s0 = inlined_call_operand.hbm [shape: f32[64,128], index: 0, kind: input, shape index: {}]   ;;  %s463_s1 = inlined_call_operand.vmem [shape: f32[1,128], index: 1, kind: input, shape index: {}]   ;;  %s464_s2 = inlined_call_operand.vmem [shape: f32[1,128], index: 2, kind: input, shape index: {}]   ;;  %s465_s3 = inlined_call_operand.hbm [shape: f32[64,128], index: 3, kind: output, shape index: {}]  }
   0x1   :  { %9 = vsyncpa [#allocation4], 0  ;;  %s335_s12 = smov [#allocation2]  }
   0x2   :  { %s15_s13 = sshll.u32 %s335_s12, 4  ;;  %s16_s13 = int_to_ptr.vmem [resolvable:$true] %s15_s13 }
   0x3   :  { %s299_s14 = scalar_lea.vmem %s16_s13, 1024  ;;  %p304_p1 = scmp.lt.s32.totalorder %s16_s13, %s16_s13 }
   0x4   :  { %p300_p0 = scmp.ne.s32.totalorder %s16_s13, %s299_s14  ;;  %p305_p2 = scmp.lt.s32.totalorder %s299_s14, %s299_s14 }
   0x6   :  { %p306_p3 = por %p305_p2, %p304_p1 }
   0x8   :  { %p307_p4 = pnand %p306_p3, %p300_p0 }
   0xa   :  { %310 = shalt.err (!%p307_p4)
}
   0xb   :  { %s336_s15 = smov 128   ;;  %s337_s16 = smov 8  }
   0xc   :  { %21 = dma.hbm_to_vmem [thread:$0]  %s462_s0, 1024, %s16_s13, [#allocation3], %s336_s15, %s336_s15, %s337_s16  }
   0xd   :  { %331 = dma.done.wait [#allocation3], 1024  }
   0xe   :  { %332 = vsyncadd [#allocation3], 4294966272  ;;  %v29_v0 = vld [vmem:[#allocation2] sm:$0xff]  ;;  %v31_v1 = vld [vmem:[#allocation2 + $0x10] sm:$0xff] }
   0xf   :  { %37 = vadd.xlane.f32.xlu0 %v29_v0  ;;  %41 = vadd.xlane.f32.xlu1 %v31_v1  ;;  %v30_v2 = vld [vmem:[#allocation2 + $0x8] sm:$0xff]  ;;  %v32_v3 = vld [vmem:[#allocation2 + $0x18] sm:$0xff]  ;;  %v33_v4 = vld [vmem:[#allocation2 + $0x20] sm:$0xff] }
  0x10   :  { %v34_v5 = vld [vmem:[#allocation2 + $0x28] sm:$0xff]  ;;  %v35_v6 = vld [vmem:[#allocation2 + $0x30] sm:$0xff]  ;;  %v36_v7 = vld [vmem:[#allocation2 + $0x38] sm:$0xff] }
  0x11   :  { %v253_v61 = vld [vmem:[%s463_s1] ss:$0 sm:$0xff]  ;;  %s338_s1 = smov [#allocation5]  }
  0x13   :  { %39 = vadd.xlane.f32.xlu0 %v30_v2  ;;  %43 = vadd.xlane.f32.xlu1 %v32_v3 }
  0x17   :  { %45 = vadd.xlane.f32.xlu0 %v33_v4  ;;  %47 = vadd.xlane.f32.xlu1 %v34_v5 }
  0x1b   :  { %49 = vadd.xlane.f32.xlu0 %v35_v6  ;;  %51 = vadd.xlane.f32.xlu1 %v36_v7 }
  0x98   :  { %v38_v8 = vpop.xlane.xlu0 %37  ;;  %v42_v9 = vpop.xlane.xlu1 %41 }
  0x99   :  { %v54_v10 = vmul.f32 0.0078125, %v38_v8  ;;  %v56_v11 = vmul.f32 0.0078125, %v42_v9 }
  0x9b   :  { %v365_v12 = vsub.f32 %v29_v0, %v54_v10  ;;  %v367_v13 = vsub.f32 %v31_v1, %v56_v11 }
  0x9c   :  { %v40_v14 = vpop.xlane.xlu0 %39  ;;  %v44_v15 = vpop.xlane.xlu1 %43 }
  0x9d   :  { %v55_v16 = vmul.f32 0.0078125, %v40_v14  ;;  %v70_v17 = vmul.f32 %v365_v12, %v365_v12  ;;  %v57_v18 = vmul.f32 0.0078125, %v44_v15  ;;  %v72_v21 = vmul.f32 %v367_v13, %v367_v13 }
  0x9f   :  { %v371_v19 = vsub.f32 %v30_v2, %v55_v16  ;;  %78 = vadd.xlane.f32.xlu0 %v70_v17  ;;  %v373_v20 = vsub.f32 %v32_v3, %v57_v18  ;;  %v403_v3 = vld [vmem:[%s464_s2] ss:$0 sm:$0xff]  ;;  %s241_s2 = sshll.u32 %s338_s1, 4  ;;  %s242_s2 = int_to_ptr.vmem [resolvable:$true] %s241_s2 }
  0xa0   :  { %v46_v22 = vpop.xlane.xlu0 %45  ;;  %v48_v23 = vpop.xlane.xlu1 %47  ;;  %s311_s22 = scalar_lea.vmem %s242_s2, 1024  ;;  %p316_p6 = scmp.lt.s32.totalorder %s242_s2, %s242_s2 }
  0xa1   :  { %v58_v24 = vmul.f32 0.0078125, %v46_v22  ;;  %v71_v25 = vmul.f32 %v371_v19, %v371_v19  ;;  %v59_v26 = vmul.f32 0.0078125, %v48_v23  ;;  %v73_v29 = vmul.f32 %v373_v20, %v373_v20  ;;  %p312_p5 = scmp.ne.s32.totalorder %s242_s2, %s311_s22  ;;  %p317_p7 = scmp.lt.s32.totalorder %s311_s22, %s311_s22 }
  0xa3   :  { %v379_v27 = vsub.f32 %v33_v4, %v58_v24  ;;  %82 = vadd.xlane.f32.xlu0 %v72_v21  ;;  %80 = vadd.xlane.f32.xlu1 %v71_v25  ;;  %v381_v28 = vsub.f32 %v34_v5, %v59_v26  ;;  %p318_p8 = por %p317_p7, %p316_p6 }
  0xa4   :  { %v50_v30 = vpop.xlane.xlu0 %49  ;;  %v52_v31 = vpop.xlane.xlu1 %51 }
  0xa5   :  { %v60_v32 = vmul.f32 0.0078125, %v50_v30  ;;  %v74_v33 = vmul.f32 %v379_v27, %v379_v27  ;;  %v61_v34 = vmul.f32 0.0078125, %v52_v31  ;;  %v75_v37 = vmul.f32 %v381_v28, %v381_v28  ;;  %p319_p9 = pnand %p318_p8, %p312_p5 }
  0xa7   :  { %v387_v35 = vsub.f32 %v35_v6, %v60_v32  ;;  %84 = vadd.xlane.f32.xlu1 %v73_v29  ;;  %86 = vadd.xlane.f32.xlu0 %v74_v33  ;;  %v389_v36 = vsub.f32 %v36_v7, %v61_v34 }
  0xa9   :  { %v76_v38 = vmul.f32 %v387_v35, %v387_v35  ;;  %v77_v39 = vmul.f32 %v389_v36, %v389_v36 }
  0xab   :  { %88 = vadd.xlane.f32.xlu1 %v75_v37  ;;  %90 = vadd.xlane.f32.xlu0 %v76_v38 }
  0xaf   :  { %92 = vadd.xlane.f32.xlu1 %v77_v39 }
 0x128   :  { %v79_v40 = vpop.xlane.xlu0 %78 }
 0x129   :  { %v94_v41 = vmul.f32 0.0078125, %v79_v40 }
 0x12b   :  { %v102_v42 = vadd.f32 1e-05, %v94_v41 }
 0x12c   :  { %v81_v43 = vpop.xlane.xlu1 %80  ;;  %v83_v44 = vpop.xlane.xlu0 %82 }
 0x12d   :  { %259 = vrsqrt.f32 %v102_v42  ;;  %v95_v45 = vmul.f32 0.0078125, %v81_v43  ;;  %v96_v46 = vmul.f32 0.0078125, %v83_v44 }
 0x12f   :  { %v103_v47 = vadd.f32 1e-05, %v95_v45  ;;  %v104_v48 = vadd.f32 1e-05, %v96_v46 }
 0x130   :  { %v85_v49 = vpop.xlane.xlu1 %84  ;;  %v87_v50 = vpop.xlane.xlu0 %86 }
 0x131   :  { %261 = vrsqrt.f32 %v103_v47  ;;  %v97_v51 = vmul.f32 0.0078125, %v85_v49  ;;  %v98_v52 = vmul.f32 0.0078125, %v87_v50 }
 0x132   :  { %263 = vrsqrt.f32 %v104_v48 }
 0x133   :  { %v105_v53 = vadd.f32 1e-05, %v97_v51  ;;  %v106_v54 = vadd.f32 1e-05, %v98_v52 }
 0x134   :  { %v89_v55 = vpop.xlane.xlu1 %88  ;;  %v91_v56 = vpop.xlane.xlu0 %90 }
 0x135   :  { %265 = vrsqrt.f32 %v105_v53  ;;  %v99_v57 = vmul.f32 0.0078125, %v89_v55  ;;  %v100_v58 = vmul.f32 0.0078125, %v91_v56 }
 0x136   :  { %267 = vrsqrt.f32 %v106_v54 }
 0x137   :  { %v107_v59 = vadd.f32 1e-05, %v99_v57  ;;  %v108_v60 = vadd.f32 1e-05, %v100_v58 }
 0x138   :  { %v93_v62 = vpop.xlane.xlu1 %92 }
 0x139   :  { %269 = vrsqrt.f32 %v107_v59  ;;  %v101_v63 = vmul.f32 0.0078125, %v93_v62 }
 0x13a   :  { %v260_v0 = vpop.eup %259  ;;  %271 = vrsqrt.f32 %v108_v60 }
 0x13b   :  { %v126_v1 = vmul.f32 %v260_v0, %v253_v61  ;;  %v109_v2 = vadd.f32 1e-05, %v101_v63 }
 0x13d   :  { %v134_v4 = vmul.f32 %v126_v1, %v365_v12  ;;  %273 = vrsqrt.f32 %v109_v2 }
 0x13e   :  { %v262_v5 = vpop.eup %261 }
 0x13f   :  { %v264_v6 = vpop.eup %263  ;;  %v407_v7 = vadd.f32 %v403_v3, %v134_v4  ;;  %v127_v8 = vmul.f32 %v262_v5, %v253_v61 }
 0x140   :  { %v128_v9 = vmul.f32 %v264_v6, %v253_v61 }
 0x141   :  { %v156_v10 = vmul.f32 %v407_v7, %v407_v7  ;;  %v135_v11 = vmul.f32 %v127_v8, %v371_v19 }
 0x142   :  { %v266_v14 = vpop.eup %265  ;;  %v136_v15 = vmul.f32 %v128_v9, %v367_v13 }
 0x143   :  { %v268_v16 = vpop.eup %267  ;;  %v164_v17 = vmul.f32 %v156_v10, %v407_v7  ;;  %v415_v12 = vadd.f32 %v403_v3, %v135_v11  ;;  %v129_v18 = vmul.f32 %v266_v14, %v253_v61 }
 0x144   :  { %v418_v21 = vadd.f32 %v403_v3, %v136_v15  ;;  %v130_v22 = vmul.f32 %v268_v16, %v253_v61 }
 0x145   :  { %v172_v23 = vmul.f32 0.044715, %v164_v17  ;;  %v157_v24 = vmul.f32 %v415_v12, %v415_v12  ;;  %v137_v19 = vmul.f32 %v129_v18, %v373_v20 }
 0x146   :  { %v270_v25 = vpop.eup %269  ;;  %v158_v13 = vmul.f32 %v418_v21, %v418_v21  ;;  %v138_v26 = vmul.f32 %v130_v22, %v379_v27  ;;  %v197_v22 = vmul.f32 0.5, %v415_v12 }
 0x147   :  { %v272_v29 = vpop.eup %271  ;;  %v180_v30 = vadd.f32 %v172_v23, %v407_v7  ;;  %v165_v31 = vmul.f32 %v157_v24, %v415_v12  ;;  %v429_v32 = vadd.f32 %v403_v3, %v137_v19  ;;  %v131_v33 = vmul.f32 %v270_v25, %v253_v61 }
 0x148   :  { %v166_v34 = vmul.f32 %v158_v13, %v418_v21  ;;  %v433_v37 = vadd.f32 %v403_v3, %v138_v26  ;;  %v132_v20 = vmul.f32 %v272_v29, %v253_v61  ;;  %v198_v24 = vmul.f32 0.5, %v418_v21 }
 0x149   :  { %v188_v38 = vmul.f32 0.7978846, %v180_v30  ;;  %v173_v39 = vmul.f32 0.044715, %v165_v31  ;;  %v159_v27 = vmul.f32 %v429_v32, %v429_v32  ;;  %v139_v43 = vmul.f32 %v131_v33, %v381_v28 }
 0x14a   :  { %v274_v40 = vpop.eup %273  ;;  %v174_v41 = vmul.f32 0.044715, %v166_v34  ;;  %v160_v42 = vmul.f32 %v433_v37, %v433_v37  ;;  %v140_v46 = vmul.f32 %v132_v20, %v387_v35  ;;  %v200_v31 = vmul.f32 0.5, %v433_v37 }
 0x14b   :  { %275 = vtanh.f32 %v188_v38  ;;  %v181_v44 = vadd.f32 %v173_v39, %v415_v12  ;;  %v167_v45 = vmul.f32 %v159_v27, %v429_v32  ;;  %v153_v49 = vadd.f32 %v403_v3, %v139_v43 }
 0x14c   :  { %v182_v47 = vadd.f32 %v174_v41, %v418_v21  ;;  %v168_v48 = vmul.f32 %v160_v42, %v433_v37  ;;  %v133_v50 = vmul.f32 %v274_v40, %v253_v61  ;;  %v154_v53 = vadd.f32 %v403_v3, %v140_v46 }
 0x14d   :  { %v189_v51 = vmul.f32 0.7978846, %v181_v44  ;;  %v175_v52 = vmul.f32 0.044715, %v167_v45  ;;  %v161_v55 = vmul.f32 %v153_v49, %v153_v49  ;;  %v201_v21 = vmul.f32 0.5, %v153_v49 }
 0x14e   :  { %v190_v54 = vmul.f32 0.7978846, %v182_v47  ;;  %v176_v28 = vmul.f32 0.044715, %v168_v48  ;;  %v162_v57 = vmul.f32 %v154_v53, %v154_v53  ;;  %v141_v59 = vmul.f32 %v133_v50, %v389_v36 }
 0x14f   :  { %277 = vtanh.f32 %v189_v51  ;;  %v183_v56 = vadd.f32 %v175_v52, %v429_v32  ;;  %v169_v58 = vmul.f32 %v161_v55, %v153_v49  ;;  %v196_v36 = vmul.f32 0.5, %v407_v7 }
 0x150   :  { %279 = vtanh.f32 %v190_v54  ;;  %v184_v35 = vadd.f32 %v176_v28, %v433_v37  ;;  %v170_v62 = vmul.f32 %v162_v57, %v154_v53  ;;  %v155_v0 = vadd.f32 %v403_v3, %v141_v59 }
 0x151   :  { %v191_v60 = vmul.f32 0.7978846, %v183_v56  ;;  %v177_v63 = vmul.f32 0.044715, %v169_v58  ;;  %v199_v7 = vmul.f32 0.5, %v429_v32  ;;  %v202_v27 = vmul.f32 0.5, %v154_v53 }
 0x152   :  { %v192_v61 = vmul.f32 0.7978846, %v184_v35  ;;  %v178_v1 = vmul.f32 0.044715, %v170_v62  ;;  %v163_v4 = vmul.f32 %v155_v0, %v155_v0  ;;  %v203_v37 = vmul.f32 0.5, %v155_v0 }
 0x153   :  { %281 = vtanh.f32 %v191_v60  ;;  %v185_v2 = vadd.f32 %v177_v63, %v153_v49 }
 0x154   :  { %283 = vtanh.f32 %v192_v61  ;;  %v186_v5 = vadd.f32 %v178_v1, %v154_v53  ;;  %v171_v8 = vmul.f32 %v163_v4, %v155_v0 }
 0x155   :  { %v193_v6 = vmul.f32 0.7978846, %v185_v2 }
 0x156   :  { %v194_v9 = vmul.f32 0.7978846, %v186_v5  ;;  %v179_v11 = vmul.f32 0.044715, %v171_v8 }
 0x157   :  { %285 = vtanh.f32 %v193_v6 }
 0x158   :  { %v276_v10 = vpop.eup %275  ;;  %287 = vtanh.f32 %v194_v9  ;;  %v187_v15 = vadd.f32 %v179_v11, %v155_v0 }
 0x159   :  { %v212_v14 = vadd.f32 1.0, %v276_v10 }
 0x15a   :  { %v195_v3 = vmul.f32 0.7978846, %v187_v15 }
 0x15b   :  { %v220_v16 = vmul.f32 %v212_v14, %v196_v36 }
 0x15c   :  { %v278_v17 = vpop.eup %277  ;;  %289 = vtanh.f32 %v195_v3 }
 0x15d   :  { %v280_v18 = vpop.eup %279  ;;  %v213_v23 = vadd.f32 1.0, %v278_v17  ;;  %228 = vst [vmem:[#allocation5] sm:$0xff] %v220_v16 }
 0x15e   :  { %v214_v19 = vadd.f32 1.0, %v280_v18 }
 0x15f   :  { %v221_v25 = vmul.f32 %v213_v23, %v197_v22 }
 0x160   :  { %v282_v13 = vpop.eup %281  ;;  %v222_v26 = vmul.f32 %v214_v19, %v198_v24 }
 0x161   :  { %v284_v29 = vpop.eup %283  ;;  %v215_v30 = vadd.f32 1.0, %v282_v13  ;;  %229 = vst [vmem:[#allocation5 + $0x8] sm:$0xff] %v221_v25 }
 0x162   :  { %v216_v33 = vadd.f32 1.0, %v284_v29  ;;  %230 = vst [vmem:[#allocation5 + $0x10] sm:$0xff] %v222_v26 }
 0x163   :  { %v223_v34 = vmul.f32 %v215_v30, %v199_v7 }
 0x164   :  { %v224_v12 = vmul.f32 %v216_v33, %v200_v31  ;;  %v286_v20 = vpop.eup %285 }
 0x165   :  { %231 = vst [vmem:[#allocation5 + $0x18] sm:$0xff] %v223_v34  ;;  %v288_v38 = vpop.eup %287  ;;  %v217_v39 = vadd.f32 1.0, %v286_v20 }
 0x166   :  { %232 = vst [vmem:[#allocation5 + $0x20] sm:$0xff] %v224_v12  ;;  %v218_v40 = vadd.f32 1.0, %v288_v38 }
 0x167   :  { %v225_v41 = vmul.f32 %v217_v39, %v201_v21 }
 0x168   :  { %v226_v42 = vmul.f32 %v218_v40, %v202_v27 }
 0x169   :  { %233 = vst [vmem:[#allocation5 + $0x28] sm:$0xff] %v225_v41  ;;  %v290_v32 = vpop.eup %289 }
 0x16a   :  { %234 = vst [vmem:[#allocation5 + $0x30] sm:$0xff] %v226_v42  ;;  %v219_v43 = vadd.f32 1.0, %v290_v32 }
 0x16c   :  { %v227_v44 = vmul.f32 %v219_v43, %v203_v37 }
 0x16e   :  { %235 = vst [vmem:[#allocation5 + $0x38] sm:$0xff] %v227_v44 }
 0x16f   :  { %322 = shalt.err (!%p319_p9)
}
 0x170   :  { %247 = dma.vmem_to_hbm [thread:$0]  %s242_s2, 1024, %s465_s3, [#allocation4], %s336_s15, %s336_s15, %s337_s16  }
 0x171   :  { %333 = dma.done.wait [#allocation4], 1024  }
 0x172   :  { %334 = vsyncadd [#allocation4], 4294966272 }
 0x173   :  { %251 = vsyncpa [#allocation3], 1 }
 0x174   :  { %252 = vsyncpa [#allocation4], 1 }

</bundles_post_ra>
